<compile_context>
chip_gen: v7x
topology: tpu7x:2x2x1
jax: 0.10.0
libtpu: 0.0.40
codegen_flags: <defaults>
</compile_context>

<pallas_src>
import functools

import jax
import jax.numpy as jnp
from jax.experimental import pallas as pl
from jax.experimental.pallas import tpu as pltpu


INPUT_DIM = 784
OUT_SIZE = 10
O_PAD = 128  # lane-dense padded output width (multiple of 128)


def _cdiv(a, b):
    return (a + b - 1) // b


def _round_up(x, m):
    return _cdiv(x, m) * m


def hebb_forward_kernel(x_ref, wt_ref, o_ref):
    # x_ref : (TB, D)      f32 activation tile (cast to MXU dtype in-VMEM)
    # wt_ref: (D, O_PAD)   pre-staged weight, resident across the grid
    # o_ref : (TB, O_PAD)  lane-dense output tile
    x = x_ref[...].astype(wt_ref.dtype)  # cheap VPU cast, zero extra HBM bytes
    o_ref[...] = jnp.dot(
        x, wt_ref[...], preferred_element_type=jnp.float32
    ).astype(o_ref.dtype)


def prestage_hebb_weight(w, o_pad=O_PAD, compute_dtype=jnp.bfloat16):
    """Called ONCE per weight update (after hebb.local_update()), not per forward.

    w: (out_size, input_dim) nn.Linear-style weight.
    returns: (input_dim, o_pad) lane-dense, zero-padded RHS in compute_dtype.
    """
    O, D = w.shape
    wt = jnp.pad(w.T, ((0, 0), (0, o_pad - O)))  # (D, o_pad), extra cols = 0
    if compute_dtype is not None:
        wt = wt.astype(compute_dtype)
    return wt


@functools.partial(jax.jit, static_argnames=("out_size", "tb"))
def method_hebbian_rc_forward(x, wt_padded, *, out_size=OUT_SIZE, tb=2048):
    """Forward pass of MethodHebbian_RC: latent = hebb(x) = x @ w.T.

    x:         (B, 784) float32 (flattened MNIST)
    wt_padded: (784, O_PAD) pre-staged weight from prestage_hebb_weight()
    returns:   (B, out_size) float32
    """
    B, D = x.shape
    Dw, OP = wt_padded.shape
    assert Dw == D and OP % 128 == 0 and out_size <= OP

    # Batch tile: multiple of 8 (sublanes), capped so the grid has >= 2 steps
    # whenever the batch allows it (v7x megacore gets both TCs busy).
    TB = min(tb, max(8, _round_up(_cdiv(B, 2), 8)))
    grid = (_cdiv(B, TB),)  # ragged last tile handled by Pallas (no jnp.pad copy)

    # Padded output in the weight dtype (bf16 halves the throwaway-column
    # writeback); wrapper restores f32 on the sliced (B, out_size) result.
    out_dtype = wt_padded.dtype

    # VMEM sizing uses the LANE-PADDED widths: D=784 rounds up to 896 lanes.
    d_pad = _round_up(D, 128)
    vmem_need = (
        2 * TB * d_pad * x.dtype.itemsize                 # double-buffered x tiles
        + 2 * TB * OP * jnp.dtype(out_dtype).itemsize     # double-buffered out tiles
        + 2 * d_pad * OP * wt_padded.dtype.itemsize       # weight buffers
    )
    vmem_limit = int(min(max(vmem_need * 5 // 4, 16 * 2**20), 48 * 2**20))

    cost = pl.CostEstimate(
        flops=2 * B * D * OP,
        transcendentals=0,
        bytes_accessed=(
            B * D * x.dtype.itemsize
            + D * OP * wt_padded.dtype.itemsize
            + B * OP * jnp.dtype(out_dtype).itemsize
        ),
    )

    out = pl.pallas_call(
        hebb_forward_kernel,
        out_shape=jax.ShapeDtypeStruct((B, OP), out_dtype),
        grid=grid,
        in_specs=[
            pl.BlockSpec((TB, D), lambda i: (i, 0)),   # batch-tiled activations
            pl.BlockSpec((D, OP), lambda i: (0, 0)),   # weight resident across grid
        ],
        out_specs=pl.BlockSpec((TB, OP), lambda i: (i, 0)),
        compiler_params=pltpu.CompilerParams(
            dimension_semantics=("parallel",),  # shard batch tiles across TCs (v7x)
            vmem_limit_bytes=vmem_limit,
        ),
        cost_estimate=cost,
    )(x, wt_padded)

    # Strip the zero lane-padding columns and restore f32 for downstream (RC).
    return out[:, :out_size].astype(jnp.float32)


if __name__ == "__main__":
    key = jax.random.PRNGKey(0)
    kx, kw = jax.random.split(key)

    B, D, O = 8, INPUT_DIM, OUT_SIZE  # batch=8, input_dim=784, out_size=10
    x = jax.random.normal(kx, (B, D), dtype=jnp.float32)
    # Deterministic parameter init (Kaiming-ish scale for a 784 -> 10 linear).
    w = jax.random.normal(kw, (O, D), dtype=jnp.float32) * (1.0 / jnp.sqrt(D))

    # Pre-stage the weight once (refreshed only after hebb.local_update()),
    # bf16 for a single-pass MXU matmul on every generation.
    wt_padded = prestage_hebb_weight(w)

    # Small-batch path (single grid step).
    out_small = method_hebbian_rc_forward(x, wt_padded)
    jax.block_until_ready(out_small)
    ref_small = x @ w.T
    assert out_small.shape == (B, O)
    assert jnp.allclose(out_small, ref_small, atol=5e-2, rtol=5e-2)

    # Multi-tile + ragged-last-tile path (grid > 1, resident weight, no jnp.pad).
    B2 = 50
    x2 = jax.random.normal(jax.random.PRNGKey(1), (B2, D), dtype=jnp.float32)
    out_big = method_hebbian_rc_forward(x2, wt_padded, tb=16)
    jax.block_until_ready(out_big)
    ref_big = x2 @ w.T
    assert out_big.shape == (B2, O)
    assert jnp.allclose(out_big, ref_big, atol=5e-2, rtol=5e-2)

    # Optional exact-f32 path (compute_dtype=None) for parity-sensitive runs.
    wt_padded_f32 = prestage_hebb_weight(w, compute_dtype=None)
    out_f32 = method_hebbian_rc_forward(x2, wt_padded_f32, tb=16)
    jax.block_until_ready(out_f32)
    assert out_f32.shape == (B2, O)
    assert jnp.allclose(out_f32, ref_big, atol=5e-2, rtol=5e-2)

    print("KERNEL_OK")
</pallas_src>

<mosaic_0001>
module attributes {stable_mosaic.version = 11 : i64} {
  func.func @hebb_forward_kernel(%arg0: i32, %arg1: memref<8x784xf32, #tpu.memory_space<vmem>>, %arg2: memref<784x128xbf16, #tpu.memory_space<vmem>>, %arg3: memref<8x128xbf16, #tpu.memory_space<vmem>>) attributes {dimension_semantics = [#tpu.dimension_semantics<parallel>], iteration_bounds = array<i64: 1>, scalar_prefetch = 0 : i64, scratch_operands = 0 : i64, tpu.core_type = #tpu.core_type<tc>, window_params = [{transform_indices = @transform_0, window_bounds = array<i64: 8, 784>}, {pipeline_mode = #tpu.pipeline_mode<synchronous>, transform_indices = @transform_1, window_bounds = array<i64: 784, 128>}, {transform_indices = @transform_2, window_bounds = array<i64: 8, 128>}]} {
    %c0 = arith.constant 0 : index
    %c0_0 = arith.constant 0 : index
    %0 = vector.load %arg1[%c0, %c0_0] : memref<8x784xf32, #tpu.memory_space<vmem>>, vector<8x784xf32>
    %1 = arith.truncf %0 : vector<8x784xf32> to vector<8x784xbf16>
    %c0_1 = arith.constant 0 : index
    %c0_2 = arith.constant 0 : index
    %2 = vector.load %arg2[%c0_1, %c0_2] : memref<784x128xbf16, #tpu.memory_space<vmem>>, vector<784x128xbf16>
    %cst = arith.constant dense<0.000000e+00> : vector<8x128xf32>
    %3 = tpu.matmul %1, %2, %cst {dimension_numbers = #tpu.dot_dimension_numbers<[1], [0], [0], [1], [0, 0, 1, 1], [], []>} : vector<8x784xbf16>, vector<784x128xbf16>, vector<8x128xf32> -> vector<8x128xf32>
    %4 = arith.truncf %3 : vector<8x128xf32> to vector<8x128xbf16>
    %c0_3 = arith.constant 0 : index
    %c0_4 = arith.constant 0 : index
    %5 = vector.load %arg3[%c0_3, %c0_4] : memref<8x128xbf16, #tpu.memory_space<vmem>>, vector<8x128xbf16>
    tpu.vector_store %arg3[%c0_3, %c0_4], %4 {strides = array<i32>} : memref<8x128xbf16, #tpu.memory_space<vmem>>, vector<8x128xbf16>,
    return
  }
  func.func @transform_0(%arg0: i32) -> (i32, i32) {
    %c0_i32 = arith.constant 0 : i32
    %c0_i32_0 = arith.constant 0 : i32
    return %arg0, %c0_i32 : i32, i32
  }
  func.func @transform_1(%arg0: i32) -> (i32, i32) {
    %c0_i32 = arith.constant 0 : i32
    %c0_i32_0 = arith.constant 0 : i32
    %c0_i32_1 = arith.constant 0 : i32
    return %c0_i32, %c0_i32_0 : i32, i32
  }
  func.func @transform_2(%arg0: i32) -> (i32, i32) {
    %c0_i32 = arith.constant 0 : i32
    %c0_i32_0 = arith.constant 0 : i32
    return %arg0, %c0_i32 : i32, i32
  }
}

</mosaic_0001>

<bundles_post_ra>
// kernel: method_hebbian_rc_forward.1
= control target key start
LH: loop header
LB: loop body
LE: loop exit
PB: predicated region body
PF: predicated region fallthrough
CT: control target
= control target key end

     0   :  { %7 = vsyncpa [#allocation3], 0  ;;  %s898_s0 = inlined_call_operand.hbm [shape: f32[8,784], index: 0, kind: input, shape index: {}]   ;;  %s899_s1 = inlined_call_operand.hbm [shape: bf16[784,128], index: 1, kind: input, shape index: {}]   ;;  %s900_s2 = inlined_call_operand.vmem [shape: bf16[8,128], index: 2, kind: output, shape index: {}]  }
   0x1   :  { %8 = vsyncpa [#allocation5], 0  ;;  %s843_s9 = smov [#allocation2]   ;;  %s844_s11 = smov [#allocation4]  }
   0x2   :  { %s15_s10 = sshll.u32 %s843_s9, 4  ;;  %s24_s12 = sshll.u32 %s844_s11, 4  ;;  %s16_s10 = int_to_ptr.vmem [resolvable:$true] %s15_s10  ;;  %s864_s12 = int_to_ptr.vmem [resolvable:$true] %s24_s12 }
   0x3   :  { %s795_s15 = scalar_lea.hbm %s898_s0, 896 }
   0x4   :  { %p796_p0 = scmp.ne.s32.totalorder %s898_s0, %s795_s15  ;;  %p799_p1 = scmp.lt.u32.totalorder %s795_s15, %s898_s0 }
   0x6   :  { %p801_p2 = pnand %p799_p1, %p796_p0 }
   0x8   :  { %804 = shalt.err (!%p801_p2)
}
   0x9   :  { %s805_s20 = scalar_lea.vmem %s16_s10, 896  ;;  %p810_p4 = scmp.lt.s32.totalorder %s16_s10, %s16_s10 }
   0xa   :  { %p806_p3 = scmp.ne.s32.totalorder %s16_s10, %s805_s20  ;;  %p811_p5 = scmp.lt.s32.totalorder %s805_s20, %s805_s20 }
   0xc   :  { %p812_p6 = por %p811_p5, %p810_p4 }
   0xe   :  { %p813_p7 = pnand %p812_p6, %p806_p3 }
  0x10   :  { %816 = shalt.err (!%p813_p7)
}
  0x11   :  { %18 = dma.hbm_to_vmem [thread:$0]  %s898_s0, 896, %s16_s10, [#allocation3]  }
  0x12   :  { %s817_s25 = scalar_lea.hbm %s899_s1, 6272 }
  0x13   :  { %p818_p8 = scmp.ne.s32.totalorder %s899_s1, %s817_s25  ;;  %p821_p9 = scmp.lt.u32.totalorder %s817_s25, %s899_s1 }
  0x15   :  { %p823_p10 = pnand %p821_p9, %p818_p8 }
  0x17   :  { %826 = shalt.err (!%p823_p10)
}
  0x18   :  { %s827_s30 = scalar_lea.vmem %s864_s12, 6272  ;;  %p832_p12 = scmp.lt.s32.totalorder %s864_s12, %s864_s12 }
  0x19   :  { %p828_p11 = scmp.ne.s32.totalorder %s864_s12, %s827_s30  ;;  %p833_p13 = scmp.lt.s32.totalorder %s827_s30, %s827_s30 }
  0x1b   :  { %p834_p0 = por %p833_p13, %p832_p12 }
  0x1d   :  { %p835_p1 = pnand %p834_p0, %p828_p11 }
  0x1f   :  { %838 = shalt.err (!%p835_p1)
}
  0x20   :  { %s845_s0 = smov 64   ;;  %s846_s3 = smov 4  }
  0x21   :  { %30 = dma.hbm_to_vmem [thread:$0]  %s899_s1, 6272, %s864_s12, [#allocation5], %s845_s0, %s845_s0, %s846_s3  }
  0x22   :  { %839 = dma.done.wait [#allocation3], 896  }
  0x23   :  { %840 = vsyncadd [#allocation3], 4294966400 }
  0x24   :  { %841 = dma.done.wait [#allocation5], 6272  }
  0x25   :  { %842 = vsyncadd [#allocation5], 4294961024  ;;  %v746_v0 = vld [vmem:[#allocation4 + $0x40] sm:$0xff]   ;;  %v750_v4 = vld [vmem:[#allocation4 + $0x48] sm:$0xff]   ;;  %v847_v41 = vmov 0.0   ;;  %vm848_vm0 = vmmov 0  }
  0x26   :  { %v747_v1 = vld [vmem:[#allocation4 + $0xc0] sm:$0xff]   ;;  %666 = vmatprep.subr.bf16.mxu0 %v746_v0  ;;  %v751_v5 = vld [vmem:[#allocation4 + $0xc8] sm:$0xff]   ;;  %v754_v8 = vld [vmem:[#allocation4 + $0x50] sm:$0xff]   ;;  %vm444_vm1 = vcmask 130048  }
  0x27   :  { %v748_v2 = vld [vmem:[#allocation4] sm:$0xff]   ;;  %688 = vmatprep.subr.bf16.mxu1 %v747_v1  ;;  %v752_v6 = vld [vmem:[#allocation4 + $0x8] sm:$0xff]   ;;  %v755_v9 = vld [vmem:[#allocation4 + $0xd0] sm:$0xff]  }
  0x28   :  { %v749_v3 = vld [vmem:[#allocation4 + $0x80] sm:$0xff]   ;;  %667 = vmatpush3.bf16.msra.mxu0 %v748_v2  ;;  %v753_v7 = vld [vmem:[#allocation4 + $0x88] sm:$0xff]   ;;  %v756_v10 = vld [vmem:[#allocation4 + $0x10] sm:$0xff]  }
  0x29   :  { %689 = vmatpush3.bf16.msra.mxu1 %v749_v3  ;;  %668 = vmatprep.subr.bf16.mxu0 %v750_v4  ;;  %v757_v11 = vld [vmem:[#allocation4 + $0x90] sm:$0xff]   ;;  %v758_v12 = vld [vmem:[#allocation4 + $0x58] sm:$0xff]   ;;  %v762_v16 = vld [vmem:[#allocation4 + $0x60] sm:$0xff]  }
  0x2a   :  { %690 = vmatprep.subr.bf16.mxu1 %v751_v5  ;;  %v759_v13 = vld [vmem:[#allocation4 + $0xd8] sm:$0xff]   ;;  %v763_v17 = vld [vmem:[#allocation4 + $0xe0] sm:$0xff]   ;;  %v766_v20 = vld [vmem:[#allocation4 + $0x68] sm:$0xff]  }
  0x2b   :  { %v760_v14 = vld [vmem:[#allocation4 + $0x18] sm:$0xff]   ;;  %v764_v18 = vld [vmem:[#allocation4 + $0x20] sm:$0xff]   ;;  %v767_v21 = vld [vmem:[#allocation4 + $0xe8] sm:$0xff]  }
  0x2c   :  { %669 = vmatpush3.bf16.msra.mxu0 %v752_v6  ;;  %v761_v15 = vld [vmem:[#allocation4 + $0x98] sm:$0xff]   ;;  %v765_v19 = vld [vmem:[#allocation4 + $0xa0] sm:$0xff]   ;;  %v768_v22 = vld [vmem:[#allocation4 + $0x28] sm:$0xff]  }
  0x2d   :  { %691 = vmatpush3.bf16.msra.mxu1 %v753_v7  ;;  %670 = vmatprep.subr.bf16.mxu0 %v754_v8  ;;  %v769_v23 = vld [vmem:[#allocation4 + $0xa8] sm:$0xff]   ;;  %v770_v24 = vld [vmem:[#allocation4 + $0x70] sm:$0xff]   ;;  %v774_v28 = vld [vmem:[#allocation4 + $0x78] sm:$0xff]  }
  0x2e   :  { %692 = vmatprep.subr.bf16.mxu1 %v755_v9  ;;  %v771_v25 = vld [vmem:[#allocation4 + $0xf0] sm:$0xff]   ;;  %v775_v29 = vld [vmem:[#allocation4 + $0xf8] sm:$0xff]   ;;  %v41_v33 = vld [vmem:[#allocation2 + $0x18] sm:$0xff] }
  0x2f   :  { %v772_v26 = vld [vmem:[#allocation4 + $0x30] sm:$0xff]   ;;  %v776_v30 = vld [vmem:[#allocation4 + $0x38] sm:$0xff]   ;;  %v38_v34 = vld [vmem:[#allocation2] sm:$0xff]  ;;  %v48_v36 = vpack.c.bf16 %v41_v33, %v41_v33 }
  0x30   :  { %671 = vmatpush3.bf16.msra.mxu0 %v756_v10  ;;  %v773_v27 = vld [vmem:[#allocation4 + $0xb0] sm:$0xff]   ;;  %v777_v31 = vld [vmem:[#allocation4 + $0xb8] sm:$0xff]   ;;  %v45_v37 = vpack.c.bf16 %v38_v34, %v38_v34  ;;  %v778_v40 = vld [vmem:[#allocation4 + $0x140] sm:$0xff]  }
  0x31   :  { %693 = vmatpush3.bf16.msra.mxu1 %v757_v11  ;;  %672 = vmatprep.subr.bf16.mxu0 %v758_v12  ;;  %v39_v32 = vld [vmem:[#allocation2 + $0x8] sm:$0xff]  ;;  %v40_v38 = vld [vmem:[#allocation2 + $0x10] sm:$0xff]  ;;  %v779_v42 = vld [vmem:[#allocation4 + $0x100] sm:$0xff]  }
  0x32   :  { %694 = vmatprep.subr.bf16.mxu1 %v759_v13  ;;  %v46_v35 = vpack.c.bf16 %v39_v32, %v39_v32  ;;  %v47_v39 = vpack.c.bf16 %v40_v38, %v40_v38  ;;  %520 = vmatprep.mubr.bf16.mxu1 %v48_v36  ;;  %v780_v43 = vld [vmem:[#allocation4 + $0x148] sm:$0xff]   ;;  %v782_v45 = vld [vmem:[#allocation4 + $0x150] sm:$0xff]   ;;  %v784_v47 = vld [vmem:[#allocation4 + $0x158] sm:$0xff]  }
  0x33   :  { %v781_v44 = vld [vmem:[#allocation4 + $0x108] sm:$0xff]   ;;  %v783_v46 = vld [vmem:[#allocation4 + $0x110] sm:$0xff]   ;;  %v785_v48 = vld [vmem:[#allocation4 + $0x118] sm:$0xff]  }
  0x34   :  { %673 = vmatpush3.bf16.msra.mxu0 %v760_v14  ;;  %480 = vmatprep.mubr.bf16.mxu0 %v46_v35  ;;  %v786_v49 = vld [vmem:[#allocation4 + $0x160] sm:$0xff]   ;;  %v43_v52 = vld [vmem:[#allocation2 + $0x28] sm:$0xff]  ;;  %v788_v53 = vld [vmem:[#allocation4 + $0x168] sm:$0xff]  }
  0x35   :  { %695 = vmatpush3.bf16.msra.mxu1 %v761_v15  ;;  %674 = vmatprep.subr.bf16.mxu0 %v762_v16  ;;  %v787_v50 = vld [vmem:[#allocation4 + $0x120] sm:$0xff]   ;;  %v50_v54 = vpack.c.bf16 %v43_v52, %v43_v52  ;;  %v44_v55 = vld [vmem:[#allocation2 + $0x30] sm:$0xff]  ;;  %v789_v57 = vld [vmem:[#allocation4 + $0x128] sm:$0xff]  }
  0x36   :  { %696 = vmatprep.subr.bf16.mxu1 %v763_v17  ;;  %v794_v51 = vld [vmem:[#allocation4 + $0x180] sm:$0xff]   ;;  %v51_v56 = vpack.c.bf16 %v44_v55, %v44_v55  ;;  %v790_v58 = vld [vmem:[#allocation4 + $0x170] sm:$0xff]   ;;  %v792_v60 = vld [vmem:[#allocation4 + $0x178] sm:$0xff]  }
  0x37   :  { %v791_v59 = vld [vmem:[#allocation4 + $0x130] sm:$0xff]   ;;  %v793_v61 = vld [vmem:[#allocation4 + $0x138] sm:$0xff]   ;;  %v42_v62 = vld [vmem:[#allocation2 + $0x20] sm:$0xff] }
  0x38   :  { %675 = vmatpush3.bf16.msra.mxu0 %v764_v18  ;;  %v49_v63 = vpack.c.bf16 %v42_v62, %v42_v62 }
  0x39   :  { %697 = vmatpush3.bf16.msra.mxu1 %v765_v19  ;;  %676 = vmatprep.subr.bf16.mxu0 %v766_v20 }
  0x3a   :  { %698 = vmatprep.subr.bf16.mxu1 %v767_v21 }
  0x3c   :  { %677 = vmatpush3.bf16.msra.mxu0 %v768_v22 }
  0x3d   :  { %699 = vmatpush3.bf16.msra.mxu1 %v769_v23  ;;  %678 = vmatprep.subr.bf16.mxu0 %v770_v24 }
  0x3e   :  { %700 = vmatprep.subr.bf16.mxu1 %v771_v25 }
  0x40   :  { %679 = vmatpush3.bf16.msra.mxu0 %v772_v26 }
  0x41   :  { %701 = vmatpush3.bf16.msra.mxu1 %v773_v27  ;;  %680 = vmatprep.subr.bf16.mxu0 %v774_v28 }
  0x42   :  { %702 = vmatprep.subr.bf16.mxu1 %v775_v29 }
  0x44   :  { %681 = vmatpush3.bf16.msra.mxu0 %v776_v30 }
  0x45   :  { %703 = vmatpush3.bf16.msra.mxu1 %v777_v31  ;;  %710 = vmatprep.subr.bf16.mxu0 %v778_v40 }
  0x46   :  { %734 = vmatprep.subr.bf16.mxu1 %v847_v41 }
  0x47   :  { %481 = vmatmul.mubr.bf16.vlgmr.msra.gmra.mrb[0].mxu0 %v45_v37 }
  0x48   :  { %521 = vmatmul.mubr.bf16.vlgmr.msra.gmra.mrb[0].mxu1 %v47_v39  ;;  %711 = vmatpush3.bf16.msra.mxu0 %v779_v42 }
  0x49   :  { %736 = vmatprep.mubr.msk.bf16.mxu1 %vm848_vm0, %v847_v41  ;;  %712 = vmatprep.subr.bf16.mxu0 %v780_v43 }
  0x4a   :  { %735 = vmatpush3.bf16.msra.mxu1 %v794_v51  ;;  %560 = vmatprep.mubr.bf16.mxu0 %v50_v54 }
  0x4c   :  { %713 = vmatpush3.bf16.msra.mxu0 %v781_v44 }
  0x4d   :  { %714 = vmatprep.subr.bf16.mxu0 %v782_v45 }
  0x50   :  { %715 = vmatpush3.bf16.msra.mxu0 %v783_v46  ;;  %737 = vmatmul.mubr.msk.bf16.vlgmr.msra.gmra.mrb[4].mxu1 %vm444_vm1, %v51_v56 }
  0x51   :  { %716 = vmatprep.subr.bf16.mxu0 %v784_v47 }
  0x54   :  { %717 = vmatpush3.bf16.msra.mxu0 %v785_v48 }
  0x55   :  { %718 = vmatprep.subr.bf16.mxu0 %v786_v49 }
  0x58   :  { %719 = vmatpush3.bf16.msra.mxu0 %v787_v50 }
  0x59   :  { %720 = vmatprep.subr.bf16.mxu0 %v788_v53 }
  0x5c   :  { %721 = vmatpush3.bf16.msra.mxu0 %v789_v57 }
  0x5d   :  { %722 = vmatprep.subr.bf16.mxu0 %v790_v58 }
  0x60   :  { %723 = vmatpush3.bf16.msra.mxu0 %v791_v59 }
  0x61   :  { %724 = vmatprep.subr.bf16.mxu0 %v792_v60 }
  0x64   :  { %725 = vmatpush3.bf16.msra.mxu0 %v793_v61 }
  0x67   :  { %561 = vmatmul.mubr.bf16.vlgmr.msra.gmra.mrb[4].mxu0 %v49_v63 }
 0x11a   :  { %v682_v0 = vpop.f32.mrb[0].mxu0 }
 0x11b   :  { %v704_v1 = vpop.f32.mrb[0].mxu1  ;;  %v683_v2 = vpop.f32.mrb[1].mxu0 }
 0x11c   :  { %v705_v3 = vpop.f32.mrb[1].mxu1  ;;  %v684_v4 = vadd.f32 %v683_v2, %v682_v0  ;;  %v685_v6 = vpop.f32.mrb[2].mxu0 }
 0x11d   :  { %v706_v5 = vadd.f32 %v705_v3, %v704_v1  ;;  %v707_v7 = vpop.f32.mrb[2].mxu1  ;;  %v686_v8 = vpop.f32.mrb[3].mxu0 }
 0x11e   :  { %v708_v9 = vpop.f32.mrb[3].mxu1 }
 0x11f   :  { %v523_v10 = vadd.f32 %v706_v5, %v684_v4 }
 0x123   :  { %v602_v11 = vpop.f32.mrb[4].mxu1 }
 0x124   :  { %v738_v12 = vpop.f32.mrb[5].mxu1 }
 0x125   :  { %v605_v13 = vpop.f32.mrb[6].mxu1 }
 0x126   :  { %v739_v14 = vpop.f32.mrb[7].mxu1 }
 0x13a   :  { %v726_v15 = vpop.f32.mrb[4].mxu0 }
 0x13b   :  { %v727_v16 = vpop.f32.mrb[5].mxu0 }
 0x13c   :  { %v728_v17 = vadd.f32 %v727_v16, %v726_v15  ;;  %v729_v18 = vpop.f32.mrb[6].mxu0 }
 0x13d   :  { %v730_v19 = vpop.f32.mrb[7].mxu0 }
 0x13e   :  { %v563_v20 = vadd.f32 %v728_v17, %v523_v10 }
 0x140   :  { %v603_v21 = vadd.f32 %v602_v11, %v563_v20 }
 0x142   :  { %v608_v22 = vpack.c.bf16 %v603_v21, %v603_v21 }
 0x144   :  { %609 = vst [vmem:[%s900_s2] sm:$0xf] %v608_v22 }
 0x145   :  { %614 = vsyncpa [#allocation3], 1 }
 0x146   :  { %615 = vsyncpa [#allocation5], 1 }

</bundles_post_ra>
